<compile_context>
chip_gen: v7x
topology: tpu7x:2x2x1
jax: 0.10.0
libtpu: 0.0.40
codegen_flags: <defaults>
</compile_context>

<pallas_src>
import functools

import jax
import jax.numpy as jnp
from jax import lax
from jax.experimental import pallas as pl
from jax.experimental.pallas import tpu as pltpu


def _cdiv(a, b):
    return -(-a // b)


def _round_up(x, m):
    return _cdiv(x, m) * m


def _vmem_capacity_bytes():
    # Generation-aware cap: 128 MiB on v5e/v6e, 64 MiB per TensorCore on v7x.
    try:
        return int(pltpu.get_tpu_info().vmem_capacity_bytes)
    except Exception:
        return 64 << 20  # conservative default (v7x)


def _pick_tk(P, target):
    """Reduction tile size. Returns (tk, ragged).

    tk is either the full hidden dim, or a multiple of 128 (Pallas block
    constraint).  ragged=True means P % tk != 0 and the last K tile must be
    masked in-kernel (Pallas fills the overrun with unspecified bits).
    """
    if target >= P:
        return P, False                       # single K step, full hidden dim
    t = max(128, (target // 128) * 128)
    for cand in range(t, 127, -128):          # prefer a clean divisor: no mask
        if P % cand == 0:
            return cand, False
    return t, True


def _lmhead_kernel(x_ref, w_ref, b_ref, o_ref, acc_ref, *, valid_k, tk):
    # x_ref: [tm, tk]  w_ref: [tk, tn]  b_ref: [1, tn] (f32)  o_ref: [tm, tn]
    k = pl.program_id(2)

    # Fold the bias into the accumulator init (saves a finalize VPU pass and a
    # separate bias handling branch).
    @pl.when(k == 0)
    def _():
        acc_ref[...] = jnp.broadcast_to(b_ref[...], acc_ref.shape)

    x = x_ref[...]
    w = w_ref[...]
    if valid_k is not None:
        # Ragged hidden dim: the last K tile overruns [0, P); zero both
        # operands in the overrun (cheap VPU selects, only emitted when
        # P % tk != 0 — rare).
        k_base = k * tk
        kw = k_base + lax.broadcasted_iota(jnp.int32, w.shape, 0)
        w = jnp.where(kw < valid_k, w, jnp.zeros_like(w))
        kx = k_base + lax.broadcasted_iota(jnp.int32, x.shape, 1)
        x = jnp.where(kx < valid_k, x, jnp.zeros_like(x))

    acc_ref[...] += jnp.dot(x, w, preferred_element_type=jnp.float32)

    @pl.when(k == pl.num_programs(2) - 1)
    def _():
        o_ref[...] = acc_ref[...].astype(o_ref.dtype)


@functools.partial(jax.jit, static_argnames=("tm", "tn", "tk", "compute_dtype"))
def lm_head(pred_out, weight, bias, *, tm=None, tn=None, tk=None,
            compute_dtype=None):
    """LmHead forward.

    Args:
      pred_out: [B, U, P] activations.
      weight:   [P, V] (transpose of torch nn.Linear's [V, P] weight).  Store
                it already in the desired streaming dtype (e.g. bf16): the
                kernel streams it as-is and never converts it in HBM.
      bias:     [V]
      tm/tn/tk: optional tile overrides; default is shape-adaptive.
      compute_dtype: dtype activations are cast to before the matmul; defaults
                to weight.dtype.  Accumulation is always f32.
    Returns:
      [B, U, V] in pred_out.dtype.
    """
    B, U, P = pred_out.shape
    Pw, V = weight.shape
    assert Pw == P, "weight must be [P, V]"
    out_dtype = pred_out.dtype

    if compute_dtype is None:
        compute_dtype = weight.dtype
    cb = jnp.dtype(compute_dtype).itemsize
    ob = jnp.dtype(out_dtype).itemsize

    M = B * U
    x2d = pred_out.reshape(M, P)
    if x2d.dtype != compute_dtype:
        x2d = x2d.astype(compute_dtype)
    # Never cast the dominant [P, V] tensor inside the jit (that would add a
    # full HBM read+write of the weight every call).
    w = weight if weight.dtype == compute_dtype else weight.astype(compute_dtype)
    b2d = bias.reshape(1, V).astype(jnp.float32)

    # ---------------- tile selection ----------------
    align_m = 16 if cb < 4 else 8            # bf16 packs 16 rows per vreg
    m_full = _round_up(M, align_m)
    decode = M <= 256                        # weight streaming fully dominates

    if tm is None:
        tm = min(1024, m_full)               # big tm => fewer weight re-streams
    else:
        tm = min(_round_up(tm, align_m), m_full)
    if tm > M:
        tm = M                               # full-dim block is always legal

    tn_target = tn if tn is not None else (2048 if decode else 512)
    tn = max(128, (tn_target // 128) * 128)
    if tn >= V:
        tn = V                               # single lane-dense vocab tile

    tk_target = tk if tk is not None else (2048 if decode else 512)
    tk, k_ragged = _pick_tk(P, tk_target)

    # ---------------- VMEM budget (generation aware) ----------------
    vmem_cap = _vmem_capacity_bytes()
    vmem_budget = vmem_cap - (16 << 20)      # headroom for compiler internals

    def tile_bytes(tm_, tn_, tk_):
        return (2 * (tm_ * tk_ * cb + tk_ * tn_ * cb + tn_ * 4)  # 2x-buf inputs
                + 2 * tm_ * tn_ * ob                              # 2x-buf output
                + tm_ * tn_ * 4)                                  # f32 acc

    while tile_bytes(tm, tn, tk) > vmem_budget:
        if tn > 512:
            tn //= 2
        elif tk > 512:
            tk, k_ragged = _pick_tk(P, max(512, tk // 2))
        elif tm > 256:
            tm = max(256, tm // 2)
        else:
            break

    vmem_limit = int(min(max(tile_bytes(tm, tn, tk) + (8 << 20), 32 << 20),
                         vmem_budget))

    grid = (_cdiv(M, tm), _cdiv(V, tn), _cdiv(P, tk))

    # Account for the weight being streamed once per M tile so XLA schedules
    # neighbouring ops (e.g. the collective that usually follows) correctly.
    cost = pl.CostEstimate(
        flops=2 * M * P * V,
        transcendentals=0,
        bytes_accessed=(grid[0] * P * V * cb   # weight, re-streamed per M tile
                        + M * P * cb           # activations
                        + M * V * ob           # output
                        + V * 4),              # bias
    )

    kernel = functools.partial(
        _lmhead_kernel, valid_k=(P if k_ragged else None), tk=tk)

    # TODO(synk): v7x fp8 weight-streaming path (fp8 tiles + per-output-channel
    #   scale applied at the k==last finalize); int8 analogue on v5e/v6e.
    # TODO(synk): if a profile shows exposed weight DMA at j-tile boundaries,
    #   add pipeline_mode=pl.Buffered(3) on the weight BlockSpec (costs an
    #   extra tk*tn*cb of VMEM — mind v7x's 64 MiB).
    out2d = pl.pallas_call(
        kernel,
        out_shape=jax.ShapeDtypeStruct((M, V), out_dtype),
        grid_spec=pltpu.PrefetchScalarGridSpec(
            num_scalar_prefetch=0,
            grid=grid,
            in_specs=[
                pl.BlockSpec((tm, tk), lambda i, j, k: (i, k)),   # activations
                pl.BlockSpec((tk, tn), lambda i, j, k: (k, j)),   # weight tile
                pl.BlockSpec((1, tn), lambda i, j, k: (0, j)),    # bias tile
            ],
            out_specs=pl.BlockSpec((tm, tn), lambda i, j, k: (i, j)),
            scratch_shapes=[pltpu.VMEM((tm, tn), jnp.float32)],
        ),
        compiler_params=pltpu.CompilerParams(
            dimension_semantics=("parallel", "parallel", "arbitrary"),
            vmem_limit_bytes=vmem_limit,
        ),
        cost_estimate=cost,
    )(x2d, w, b2d)

    return out2d.reshape(B, U, V)


if __name__ == "__main__":
    # Small shapes consistent with the module's forward: [B, U, P] -> [B, U, V]
    B, U, P, V = 2, 8, 32, 256

    key = jax.random.PRNGKey(0)
    k_x, k_w, k_b = jax.random.split(key, 3)

    # PyTorch nn.Linear-style uniform +/- 1/sqrt(P) init.
    bound = 1.0 / jnp.sqrt(jnp.float32(P))
    weight = jax.random.uniform(k_w, (P, V), jnp.float32, -bound, bound)  # [P, V]
    bias = jax.random.uniform(k_b, (V,), jnp.float32, -bound, bound)      # [V]
    pred_out = jax.random.normal(k_x, (B, U, P), jnp.float32)             # [B, U, P]

    ref = jnp.einsum("bup,pv->buv", pred_out, weight) + bias

    # f32 path (tight tolerance).
    out = jax.block_until_ready(lm_head(pred_out, weight, bias))
    assert out.shape == (B, U, V)
    assert jnp.allclose(out, ref, atol=1e-5, rtol=1e-5)

    # bf16 weight-streaming path: the weight is stored in bf16 OUTSIDE the jit
    # (no in-jit convert of the dominant tensor); accumulate stays f32.
    out_bf16 = jax.block_until_ready(
        lm_head(pred_out, weight.astype(jnp.bfloat16), bias))
    assert out_bf16.shape == (B, U, V)
    assert jnp.allclose(out_bf16, ref, atol=6e-2, rtol=6e-2)

    # Odd shapes: exercises partial M/V blocks and the ragged-K masking path.
    B2, U2, P2, V2 = 2, 5, 200, 384
    kx2, kw2, kb2 = jax.random.split(jax.random.PRNGKey(1), 3)
    w2 = jax.random.uniform(kw2, (P2, V2), jnp.float32, -0.05, 0.05)
    b2 = jax.random.uniform(kb2, (V2,), jnp.float32, -0.05, 0.05)
    x2 = jax.random.normal(kx2, (B2, U2, P2), jnp.float32)
    ref2 = jnp.einsum("bup,pv->buv", x2, w2) + b2
    out2 = jax.block_until_ready(lm_head(x2, w2, b2, tm=8, tn=128, tk=128))
    assert out2.shape == (B2, U2, V2)
    assert jnp.allclose(out2, ref2, atol=1e-4, rtol=1e-4)

    print("KERNEL_OK")
</pallas_src>

<mosaic_0001>
module attributes {stable_mosaic.version = 11 : i64} {
  func.func @_lmhead_kernel(%arg0: i32, %arg1: i32, %arg2: i32, %arg3: memref<16x32xf32, #tpu.memory_space<vmem>>, %arg4: memref<32x256xf32, #tpu.memory_space<vmem>>, %arg5: memref<1x256xf32, #tpu.memory_space<vmem>>, %arg6: memref<16x256xf32, #tpu.memory_space<vmem>>, %arg7: memref<16x256xf32, #tpu.memory_space<vmem>>) attributes {dimension_semantics = [#tpu.dimension_semantics<parallel>, #tpu.dimension_semantics<parallel>, #tpu.dimension_semantics<arbitrary>], iteration_bounds = array<i64: 1, 1, 1>, scalar_prefetch = 0 : i64, scratch_operands = 1 : i64, tpu.core_type = #tpu.core_type<tc>, window_params = [{transform_indices = @transform_0, window_bounds = array<i64: 16, 32>}, {transform_indices = @transform_1, window_bounds = array<i64: 32, 256>}, {transform_indices = @transform_2, window_bounds = array<i64: 1, 256>}, {transform_indices = @transform_3, window_bounds = array<i64: 16, 256>}]} {
    %c0_i32 = arith.constant 0 : i32
    %0 = arith.cmpi eq, %arg2, %c0_i32 : i32
    %1 = arith.extui %0 : i1 to i32
    %c0_i32_0 = arith.constant 0 : i32
    %2 = arith.cmpi ne, %1, %c0_i32_0 : i32
    scf.if %2 {
      %c0_10 = arith.constant 0 : index
      %c0_11 = arith.constant 0 : index
      %12 = vector.load %arg5[%c0_10, %c0_11] : memref<1x256xf32, #tpu.memory_space<vmem>>, vector<1x256xf32>
      %13 = vector.shape_cast %12 : vector<1x256xf32> to vector<1x256xf32>
      %14 = vector.broadcast %13 : vector<1x256xf32> to vector<16x256xf32>
      %c0_12 = arith.constant 0 : index
      %c0_13 = arith.constant 0 : index
      %15 = vector.load %arg7[%c0_12, %c0_13] : memref<16x256xf32, #tpu.memory_space<vmem>>, vector<16x256xf32>
      tpu.vector_store %arg7[%c0_12, %c0_13], %14 {strides = array<i32>} : memref<16x256xf32, #tpu.memory_space<vmem>>, vector<16x256xf32>,
    } else {
    }
    %c0 = arith.constant 0 : index
    %c0_1 = arith.constant 0 : index
    %3 = vector.load %arg3[%c0, %c0_1] : memref<16x32xf32, #tpu.memory_space<vmem>>, vector<16x32xf32>
    %c0_2 = arith.constant 0 : index
    %c0_3 = arith.constant 0 : index
    %4 = vector.load %arg4[%c0_2, %c0_3] : memref<32x256xf32, #tpu.memory_space<vmem>>, vector<32x256xf32>
    %c0_4 = arith.constant 0 : index
    %c0_5 = arith.constant 0 : index
    %5 = vector.load %arg7[%c0_4, %c0_5] : memref<16x256xf32, #tpu.memory_space<vmem>>, vector<16x256xf32>
    %cst = arith.constant dense<0.000000e+00> : vector<16x256xf32>
    %6 = tpu.matmul %3, %4, %cst {dimension_numbers = #tpu.dot_dimension_numbers<[1], [0], [0], [1], [0, 0, 1, 1], [], []>} : vector<16x32xf32>, vector<32x256xf32>, vector<16x256xf32> -> vector<16x256xf32>
    %7 = arith.addf %5, %6 : vector<16x256xf32>
    %c0_6 = arith.constant 0 : index
    %c0_7 = arith.constant 0 : index
    %8 = vector.load %arg7[%c0_6, %c0_7] : memref<16x256xf32, #tpu.memory_space<vmem>>, vector<16x256xf32>
    tpu.vector_store %arg7[%c0_6, %c0_7], %7 {strides = array<i32>} : memref<16x256xf32, #tpu.memory_space<vmem>>, vector<16x256xf32>,
    %c0_i32_8 = arith.constant 0 : i32
    %9 = arith.cmpi eq, %arg2, %c0_i32_8 : i32
    %10 = arith.extui %9 : i1 to i32
    %c0_i32_9 = arith.constant 0 : i32
    %11 = arith.cmpi ne, %10, %c0_i32_9 : i32
    scf.if %11 {
      %c0_10 = arith.constant 0 : index
      %c0_11 = arith.constant 0 : index
      %12 = vector.load %arg7[%c0_10, %c0_11] : memref<16x256xf32, #tpu.memory_space<vmem>>, vector<16x256xf32>
      %c0_12 = arith.constant 0 : index
      %c0_13 = arith.constant 0 : index
      %13 = vector.load %arg6[%c0_12, %c0_13] : memref<16x256xf32, #tpu.memory_space<vmem>>, vector<16x256xf32>
      tpu.vector_store %arg6[%c0_12, %c0_13], %12 {strides = array<i32>} : memref<16x256xf32, #tpu.memory_space<vmem>>, vector<16x256xf32>,
    } else {
    }
    return
  }
  func.func @transform_0(%arg0: i32, %arg1: i32, %arg2: i32) -> (i32, i32) {
    %c0_i32 = arith.constant 0 : i32
    return %arg0, %arg2 : i32, i32
  }
  func.func @transform_1(%arg0: i32, %arg1: i32, %arg2: i32) -> (i32, i32) {
    %c0_i32 = arith.constant 0 : i32
    return %arg2, %arg1 : i32, i32
  }
  func.func @transform_2(%arg0: i32, %arg1: i32, %arg2: i32) -> (i32, i32) {
    %c0_i32 = arith.constant 0 : i32
    %c0_i32_0 = arith.constant 0 : i32
    return %c0_i32, %arg1 : i32, i32
  }
  func.func @transform_3(%arg0: i32, %arg1: i32, %arg2: i32) -> (i32, i32) {
    %c0_i32 = arith.constant 0 : i32
    return %arg0, %arg1 : i32, i32
  }
}

</mosaic_0001>

<bundles_post_ra>
// kernel: lm_head.1
= control target key start
LH: loop header
LB: loop body
LE: loop exit
PB: predicated region body
PF: predicated region fallthrough
CT: control target
= control target key end

     0   :  { %8 = vsyncpa [#allocation4], 0  ;;  %s365_s0 = inlined_call_operand.hbm [shape: f32[16,32], index: 0, kind: input, shape index: {}]   ;;  %s366_s1 = inlined_call_operand.hbm [shape: f32[32,256], index: 1, kind: input, shape index: {}]   ;;  %s367_s2 = inlined_call_operand.vmem [shape: f32[1,256], index: 2, kind: input, shape index: {}]   ;;  %s368_s3 = inlined_call_operand.hbm [shape: f32[16,256], index: 3, kind: output, shape index: {}]  }
   0x1   :  { %9 = vsyncpa [#allocation7], 0 }
   0x2   :  { %10 = vsyncpa [#allocation5], 0  ;;  %s292_s12 = smov [#allocation3]   ;;  %s220_s16 = scalar_lea.hbm %s365_s0, 256 }
   0x3   :  { %s16_s13 = sshll.u32 %s292_s12, 4  ;;  %p221_p0 = scmp.ne.s32.totalorder %s365_s0, %s220_s16  ;;  %s17_s13 = int_to_ptr.vmem [resolvable:$true] %s16_s13 }
   0x4   :  { %p224_p1 = scmp.lt.u32.totalorder %s220_s16, %s365_s0 }
   0x6   :  { %p226_p2 = pnand %p224_p1, %p221_p0 }
   0x8   :  { %229 = shalt.err (!%p226_p2)
}
   0x9   :  { %s230_s21 = scalar_lea.vmem %s17_s13, 256  ;;  %p235_p4 = scmp.lt.s32.totalorder %s17_s13, %s17_s13 }
   0xa   :  { %p231_p3 = scmp.ne.s32.totalorder %s17_s13, %s230_s21  ;;  %p236_p5 = scmp.lt.s32.totalorder %s230_s21, %s230_s21 }
   0xc   :  { %p237_p6 = por %p236_p5, %p235_p4 }
   0xe   :  { %p238_p7 = pnand %p237_p6, %p231_p3 }
  0x10   :  { %241 = shalt.err (!%p238_p7)
}
  0x11   :  { %s293_s22 = smov 128   ;;  %s294_s23 = smov 8  }
  0x12   :  { %22 = dma.hbm_to_vmem [thread:$0]  %s365_s0, 256, %s17_s13, [#allocation4], %s293_s22, %s293_s22, %s294_s23  }
  0x13   :  { %s295_s26 = smov [#allocation6]   ;;  %s242_s30 = scalar_lea.hbm %s366_s1, 1024 }
  0x14   :  { %s28_s27 = sshll.u32 %s295_s26, 4  ;;  %p243_p8 = scmp.ne.s32.totalorder %s366_s1, %s242_s30  ;;  %s29_s27 = int_to_ptr.vmem [resolvable:$true] %s28_s27 }
  0x15   :  { %p246_p9 = scmp.lt.u32.totalorder %s242_s30, %s366_s1 }
  0x17   :  { %p248_p10 = pnand %p246_p9, %p243_p8 }
  0x19   :  { %251 = shalt.err (!%p248_p10)
}
  0x1a   :  { %s252_s8 = scalar_lea.vmem %s29_s27, 1024  ;;  %p257_p12 = scmp.lt.s32.totalorder %s29_s27, %s29_s27 }
  0x1b   :  { %p253_p11 = scmp.ne.s32.totalorder %s29_s27, %s252_s8  ;;  %p258_p13 = scmp.lt.s32.totalorder %s252_s8, %s252_s8 }
  0x1d   :  { %p259_p0 = por %p258_p13, %p257_p12 }
  0x1f   :  { %p260_p1 = pnand %p259_p0, %p253_p11 }
  0x21   :  { %263 = shalt.err (!%p260_p1)
}
  0x22   :  { %s296_s0 = smov 256   ;;  %s297_s9 = smov 16  }
  0x23   :  { %34 = dma.hbm_to_vmem [thread:$0]  %s366_s1, 1024, %s29_s27, [#allocation7], %s296_s0, %s296_s0, %s297_s9  }
  0x24   :  { %286 = dma.done.wait [#allocation4], 256  }
  0x25   :  { %287 = vsyncadd [#allocation4], 4294967040 }
  0x26   :  { %288 = dma.done.wait [#allocation7], 1024  }
  0x27   :  { %289 = vsyncadd [#allocation7], 4294966272  ;;  %v298_v0 = vmov 0.0   ;;  %v66_v1 = vld [vmem:[#allocation6 + $0x8] sm:$0xff]  ;;  %v68_v2 = vld [vmem:[#allocation6 + $0x18] sm:$0xff]  ;;  %vm77_vm0 = vcmask 261120   ;;  %v49_v15 = vlaneseq }
  0x28   :  { %148 = vmatprep.mubr.f32.mxu0 %v298_v0  ;;  %154 = vmatprep.mubr.f32.mxu1 %v298_v0  ;;  %v65_v3 = vld [vmem:[#allocation6] sm:$0xff]  ;;  %v200_v4 = vpack.c.bf16 %v68_v2, %v66_v1  ;;  %v67_v5 = vld [vmem:[#allocation6 + $0x10] sm:$0xff]  ;;  %v70_v6 = vld [vmem:[#allocation6 + $0x28] sm:$0xff]  ;;  %s299_s13 = smov [#allocation8]  }
  0x29   :  { %v72_v7 = vld [vmem:[#allocation6 + $0x38] sm:$0xff]  ;;  %v202_v8 = vpack.c.bf16 %v67_v5, %v65_v3  ;;  %v69_v10 = vld [vmem:[#allocation6 + $0x20] sm:$0xff]  ;;  %v71_v11 = vld [vmem:[#allocation6 + $0x30] sm:$0xff]  ;;  %v50_v16 = vshrl.u32 %v49_v15, 7  ;;  %s185_s14 = sshll.u32 %s299_s13, 4  ;;  %s186_s14 = int_to_ptr.vmem [resolvable:$true] %s185_s14 }
  0x2a   :  { %v204_v9 = vpack.c.bf16 %v72_v7, %v70_v6  ;;  %201 = vmatprep.subr.bf16.mxu0 %v200_v4  ;;  %208 = vmatprep.subr.bf16.mxu1 %v200_v4  ;;  %v206_v12 = vpack.c.bf16 %v71_v11, %v69_v10  ;;  %v63_v13 = vld [vmem:[#allocation3] sm:$0xff]  ;;  %v64_v14 = vld [vmem:[#allocation3 + $0x8] sm:$0xff]  ;;  %s264_s15 = scalar_lea.vmem %s186_s14, 512  ;;  %p269_p3 = scmp.lt.s32.totalorder %s186_s14, %s186_s14 }
  0x2b   :  { %203 = vmatpush1.bf16.msra.mxu0 %v202_v8  ;;  %210 = vmatpush1.bf16.msra.mxu1 %v202_v8  ;;  %v51_v17 = vsub.s32 0, %v50_v16  ;;  %v47_v18 = vld [vmem:[%s367_s2] sm:$0x3]  ;;  %v55_v19 = vsub.s32 1, %v50_v16  ;;  %p265_p2 = scmp.ne.s32.totalorder %s186_s14, %s264_s15  ;;  %p270_p4 = scmp.lt.s32.totalorder %s264_s15, %s264_s15 }
  0x2c   :  { %205 = vmatprep.subr.bf16.mxu0 %v204_v9  ;;  %209 = vmatprep.subr.bf16.mxu1 %v204_v9 }
  0x2d   :  { %v52_v20 = vrot.slane %v47_v18, %v51_v17  ;;  %v56_v21 = vrot.slane %v47_v18, %v55_v19  ;;  %p271_p5 = por %p270_p4, %p269_p3 }
  0x2f   :  { %207 = vmatpush1.bf16.msra.mxu0 %v206_v12  ;;  %211 = vmatpush1.bf16.msra.mxu1 %v206_v12  ;;  %p272_p6 = pnand %p271_p5, %p265_p2 }
  0x32   :  { %198 = vmatmul.mubr.msk.f32.vlgmr.msra.gmra.mrb[0].mxu0 %vm77_vm0, %v63_v13  ;;  %199 = vmatmul.mubr.msk.f32.vlgmr.msra.gmra.mrb[0].mxu1 %vm77_vm0, %v64_v14 }
 0x105   :  { %v150_v22 = vpop.f32.mrb[0].mxu0  ;;  %v156_v23 = vpop.f32.mrb[0].mxu1 }
 0x106   :  { %v161_v24 = vadd.f32 %v150_v22, %v52_v20  ;;  %v163_v25 = vadd.f32 %v156_v23, %v52_v20  ;;  %v152_v26 = vpop.f32.mrb[1].mxu0  ;;  %v158_v27 = vpop.f32.mrb[1].mxu1 }
 0x107   :  { %v162_v28 = vadd.f32 %v152_v26, %v56_v21  ;;  %v164_v29 = vadd.f32 %v158_v27, %v56_v21 }
 0x108   :  { %176 = vst [vmem:[#allocation8] sm:$0xff] %v161_v24  ;;  %178 = vst [vmem:[#allocation8 + $0x10] sm:$0xff] %v163_v25 }
 0x109   :  { %177 = vst [vmem:[#allocation8 + $0x8] sm:$0xff] %v162_v28  ;;  %179 = vst [vmem:[#allocation8 + $0x18] sm:$0xff] %v164_v29 }
 0x10a   :  { %275 = shalt.err (!%p272_p6)
}
 0x10b   :  { %s276_s17 = scalar_lea.hbm %s368_s3, 512 }
 0x10c   :  { %p277_p7 = scmp.ne.s32.totalorder %s368_s3, %s276_s17  ;;  %p280_p8 = scmp.lt.u32.totalorder %s276_s17, %s368_s3 }
 0x10e   :  { %p282_p9 = pnand %p280_p8, %p277_p7 }
 0x110   :  { %285 = shalt.err (!%p282_p9)
}
 0x111   :  { %191 = dma.vmem_to_hbm [thread:$0]  %s186_s14, 512, %s368_s3, [#allocation5], %s296_s0, %s296_s0, %s297_s9  }
 0x112   :  { %290 = dma.done.wait [#allocation5], 512  }
 0x113   :  { %291 = vsyncadd [#allocation5], 4294966784 }
 0x114   :  { %195 = vsyncpa [#allocation4], 1 }
 0x115   :  { %196 = vsyncpa [#allocation7], 1 }
 0x116   :  { %197 = vsyncpa [#allocation5], 1 }

</bundles_post_ra>
